<compile_context>
chip_gen: v7x
topology: tpu7x:2x2x1
jax: 0.10.0
libtpu: 0.0.40
codegen_flags: <defaults>
</compile_context>

<pallas_src>
import functools

import jax
import jax.numpy as jnp
from jax.experimental import pallas as pl
from jax.experimental.pallas import tpu as pltpu


def _round_up(a, b):
    return (a + b - 1) // b * b


def _tile_loss(x_raw, t_raw, ignore_index):
    """Per-pixel NLL(log_softmax) for one (C, tile_p) tile -> (1, tile_p) f32."""
    x = x_raw.astype(jnp.float32)                            # (C, tp)
    t = t_raw.astype(jnp.int32)                              # (1, tp)

    # Numerically-stable log-sum-exp over the class (sublane) axis.
    m = jnp.max(x, axis=0, keepdims=True)                    # (1, tp)
    lse = m + jnp.log(jnp.sum(jnp.exp(x - m), axis=0, keepdims=True))

    # Gather x[target] as a one-hot select (no per-lane gather needed).
    cls = jax.lax.broadcasted_iota(jnp.int32, x.shape, 0)    # (C, tp)
    picked = jnp.sum(jnp.where(cls == t, x, 0.0), axis=0, keepdims=True)

    # NLL with ignore_index: ignored (and padded) pixels contribute exactly 0.
    valid = t != ignore_index
    return jnp.where(valid, lse - picked, 0.0)                # (1, tp)


def _ce2d_kernel_multi(x_ref, t_ref, out_ref, acc_ref, *, inv_hw, ignore_index):
    # Multi pixel-tile case: accumulate per-lane loss across the inner axis.
    j = pl.program_id(2)
    loss = _tile_loss(x_ref[...], t_ref[...], ignore_index)

    @pl.when(j == 0)
    def _():
        acc_ref[...] = jnp.zeros_like(acc_ref)

    acc_ref[...] += loss

    @pl.when(j == pl.num_programs(2) - 1)
    def _():
        # mean(dim=2).mean(dim=1) == sum over all H*W pixels / (H*W)
        total = jnp.sum(acc_ref[...], axis=1, keepdims=True) * inv_hw   # (1, 1)
        out_ref[...] = jnp.broadcast_to(total, out_ref.shape).astype(out_ref.dtype)


def _ce2d_kernel_single(x_ref, t_ref, out_ref, *, inv_hw, ignore_index):
    # Single pixel-tile case: no accumulator scratch needed.
    loss = _tile_loss(x_ref[...], t_ref[...], ignore_index)
    total = jnp.sum(loss, axis=1, keepdims=True) * inv_hw
    out_ref[...] = jnp.broadcast_to(total, out_ref.shape).astype(out_ref.dtype)


def cross_entropy_loss_2d(logits, targets, *, ignore_index=-1, tile_p=None):
    """out[n] = mean_{h,w} NLL(log_softmax(logits, axis=1), targets)[n, h, w]."""
    N, C, H, W = logits.shape
    P = H * W

    x_dtype = logits.dtype
    itemsize = jnp.dtype(x_dtype).itemsize
    if itemsize not in (1, 2, 4):
        logits = logits.astype(jnp.float32)
        x_dtype = jnp.float32
        itemsize = 4

    # Narrow targets to cut HBM traffic; upcast to int32 inside the kernel.
    if C <= 127 and -128 <= ignore_index <= 127:
        t_dtype = jnp.int8
    elif C <= 32767 and -32768 <= ignore_index <= 32767:
        t_dtype = jnp.int16
    else:
        t_dtype = jnp.int32
    t_itemsize = jnp.dtype(t_dtype).itemsize

    # ---- byte-budget tile sizing (sublane-padding aware) --------------------
    sub_mult_x = 8 * (4 // itemsize)            # f32: 8, bf16: 16, int8: 32
    padded_c = _round_up(C, sub_mult_x)
    # VMEM bytes per pixel lane: 2x logits buffers + 2x 1-row target buffers
    # (pad to ~32 B/pixel) + f32 accumulator row (~32 B/pixel).
    per_pixel_bytes = 2 * padded_c * itemsize + 2 * 32 + 32
    p_pad128 = _round_up(P, 128)
    if tile_p is None:
        budget_bytes = 8 * 1024 * 1024
        tile_p = max(128, (budget_bytes // per_pixel_bytes) // 128 * 128)
    else:
        tile_p = max(128, _round_up(int(tile_p), 128))
    tile_p = min(tile_p, p_pad128)

    nj_total = pl.cdiv(P, tile_p)
    # Give v7x's second TensorCore work when the batch axis alone can't.
    n_split = 2 if (N % 2 == 1 and nj_total >= 2) else 1
    nj_total = _round_up(nj_total, n_split)
    nj_inner = nj_total // n_split
    p_pad = nj_total * tile_p

    # Reshape pixels onto the lane axis; pad the pixel axis if needed.
    x = logits.reshape(N, C, P)
    t = targets.astype(t_dtype).reshape(N, 1, P)
    if p_pad != P:
        x = jnp.pad(x, ((0, 0), (0, 0), (0, p_pad - P)))
        t = jnp.pad(t, ((0, 0), (0, 0), (0, p_pad - P)),
                    constant_values=ignore_index)

    inv_hw = 1.0 / P     # padded / ignored pixels add 0 to the numerator

    if nj_inner == 1:
        kernel = functools.partial(_ce2d_kernel_single, inv_hw=inv_hw,
                                   ignore_index=ignore_index)
        scratch = []
    else:
        kernel = functools.partial(_ce2d_kernel_multi, inv_hw=inv_hw,
                                   ignore_index=ignore_index)
        scratch = [pltpu.VMEM((1, tile_p), jnp.float32)]

    footprint = tile_p * per_pixel_bytes + 128 * 1024
    vmem_limit = int(min(max(2 * footprint, 16 * 1024 * 1024), 64 * 1024 * 1024))

    cost = pl.CostEstimate(
        flops=int(N * p_pad * (5 * C + 8)),
        transcendentals=int(N * p_pad * (C + 1)),
        bytes_accessed=int(N * C * p_pad * itemsize + N * p_pad * t_itemsize
                           + N * n_split * 128 * 4),
    )

    x_map = lambda n, s, j: (n, 0, s * nj_inner + j)
    t_map = lambda n, s, j: (n, 0, s * nj_inner + j)
    o_map = lambda n, s, j: (n, s, 0)

    out = pl.pallas_call(
        kernel,
        out_shape=jax.ShapeDtypeStruct((N, n_split, 128), jnp.float32),
        grid_spec=pltpu.PrefetchScalarGridSpec(
            num_scalar_prefetch=0,
            grid=(N, n_split, nj_inner),
            in_specs=[
                # logits tile: (C, tile_p) — classes on sublanes, pixels on lanes
                pl.BlockSpec((None, C, tile_p), x_map),
                # targets tile: (1, tile_p) narrow int
                pl.BlockSpec((None, 1, tile_p), t_map),
            ],
            # per-(batch, split) result, resident across the pixel-tile axis
            out_specs=pl.BlockSpec((None, 1, 128), o_map),
            scratch_shapes=scratch,
        ),
        compiler_params=pltpu.CompilerParams(
            dimension_semantics=("parallel", "parallel", "arbitrary"),
            vmem_limit_bytes=vmem_limit),
        cost_estimate=cost,
    )(x, t)

    # Sum the per-split partial means (each already scaled by 1/(H*W)).
    return out[:, :, 0].sum(axis=1)                           # (N,)


def cross_entropy_loss_2d_ref(logits, targets, ignore_index=-1):
    """Pure-JAX reference mirroring the PyTorch module."""
    N, C, H, W = logits.shape
    logp = jax.nn.log_softmax(logits.astype(jnp.float32), axis=1)   # (N,C,H,W)
    t = targets.astype(jnp.int32)
    valid = t != ignore_index
    t_safe = jnp.clip(t, 0, C - 1)
    picked = jnp.take_along_axis(logp, t_safe[:, None], axis=1)[:, 0]  # (N,H,W)
    loss = jnp.where(valid, -picked, 0.0)
    return loss.mean(axis=2).mean(axis=1)                            # (N,)


def _make_inputs(key, N, C, H, W, dtype):
    k1, k2, k3 = jax.random.split(key, 3)
    logits = jax.random.normal(k1, (N, C, H, W), jnp.float32).astype(dtype)
    targets = jax.random.randint(k2, (N, H, W), 0, C, jnp.int32)
    # Sprinkle some ignore_index (-1) pixels to exercise the masking path.
    ignore = jax.random.uniform(k3, (N, H, W)) < 0.1
    targets = jnp.where(ignore, jnp.int32(-1), targets)
    return logits, targets


if __name__ == "__main__":
    key = jax.random.PRNGKey(0)
    checks = [
        # (name,               N, C, H,  W,  dtype,        tile_p, tol)
        ("f32 base",           2, 4, 16, 16, jnp.float32,  None,   1e-5),
        ("bf16 native dtype",  2, 4, 16, 16, jnp.bfloat16, None,   1e-4),
        ("pad + 2-way split",  1, 4, 9,  15, jnp.float32,  128,    1e-5),
        ("multi-tile accum",   2, 4, 16, 16, jnp.float32,  128,    1e-5),
    ]
    for i, (name, N, C, H, W, dtype, tp, tol) in enumerate(checks):
        logits, targets = _make_inputs(jax.random.fold_in(key, i), N, C, H, W,
                                       dtype)
        out = jax.block_until_ready(
            cross_entropy_loss_2d(logits, targets, tile_p=tp))
        ref = cross_entropy_loss_2d_ref(logits, targets)
        assert out.shape == (N,), (name, out.shape)
        err = float(jnp.max(jnp.abs(out - ref)))
        assert err <= tol, (name, err)
    print("KERNEL_OK")
</pallas_src>

<mosaic_0001>
module attributes {stable_mosaic.version = 11 : i64} {
  func.func @_ce2d_kernel_single(%arg0: i32, %arg1: i32, %arg2: i32, %arg3: memref<1x4x256xf32, #tpu.memory_space<vmem>>, %arg4: memref<1x1x256xi8, #tpu.memory_space<vmem>>, %arg5: memref<1x1x128xf32, #tpu.memory_space<vmem>>) attributes {dimension_semantics = [#tpu.dimension_semantics<parallel>, #tpu.dimension_semantics<parallel>, #tpu.dimension_semantics<arbitrary>], iteration_bounds = array<i64: 2, 1, 1>, scalar_prefetch = 0 : i64, scratch_operands = 0 : i64, tpu.core_type = #tpu.core_type<tc>, window_params = [{transform_indices = @transform_0, window_bounds = array<i64: 1, 4, 256>}, {transform_indices = @transform_1, window_bounds = array<i64: 1, 1, 256>}, {transform_indices = @transform_2, window_bounds = array<i64: 1, 1, 128>}]} {
    %c0 = arith.constant 0 : index
    %c0_0 = arith.constant 0 : index
    %c0_1 = arith.constant 0 : index
    %0 = vector.load %arg3[%c0, %c0_0, %c0_1] : memref<1x4x256xf32, #tpu.memory_space<vmem>>, vector<1x4x256xf32>
    %1 = vector.shape_cast %0 : vector<1x4x256xf32> to vector<4x256xf32>
    %c0_2 = arith.constant 0 : index
    %c0_3 = arith.constant 0 : index
    %c0_4 = arith.constant 0 : index
    %2 = vector.load %arg4[%c0_2, %c0_3, %c0_4] : memref<1x1x256xi8, #tpu.memory_space<vmem>>, vector<1x1x256xi8>
    %3 = vector.shape_cast %2 : vector<1x1x256xi8> to vector<1x256xi8>
    %4 = arith.extsi %3 : vector<1x256xi8> to vector<1x256xi32>
    %cst = arith.constant dense<0xFF800000> : vector<256xf32>
    %5 = vector.multi_reduction <maximumf>, %1, %cst [0] : vector<4x256xf32> to vector<256xf32>
    %6 = vector.shape_cast %5 : vector<256xf32> to vector<1x256xf32>
    %7 = vector.broadcast %6 : vector<1x256xf32> to vector<4x256xf32>
    %8 = arith.subf %1, %7 : vector<4x256xf32>
    %9 = math.exp %8 : vector<4x256xf32>
    %cst_5 = arith.constant dense<0.000000e+00> : vector<256xf32>
    %10 = vector.multi_reduction <add>, %9, %cst_5 [0] : vector<4x256xf32> to vector<256xf32>
    %11 = vector.shape_cast %10 : vector<256xf32> to vector<1x256xf32>
    %12 = math.log %11 : vector<1x256xf32>
    %13 = arith.addf %6, %12 : vector<1x256xf32>
    %14 = tpu.iota {dimensions = array<i32: 0>} : vector<4x256xi32>
    %15 = vector.broadcast %4 : vector<1x256xi32> to vector<4x256xi32>
    %16 = arith.cmpi eq, %14, %15 : vector<4x256xi32>
    %cst_6 = arith.constant 0.000000e+00 : f32
    %17 = vector.broadcast %cst_6 : f32 to vector<4x256xf32>
    %18 = arith.select %16, %1, %17 : vector<4x256xi1>, vector<4x256xf32>
    %cst_7 = arith.constant dense<0.000000e+00> : vector<256xf32>
    %19 = vector.multi_reduction <add>, %18, %cst_7 [0] : vector<4x256xf32> to vector<256xf32>
    %20 = vector.shape_cast %19 : vector<256xf32> to vector<1x256xf32>
    %c-1_i32 = arith.constant -1 : i32
    %21 = vector.broadcast %c-1_i32 : i32 to vector<1x256xi32>
    %22 = arith.cmpi ne, %4, %21 : vector<1x256xi32>
    %23 = arith.subf %13, %20 : vector<1x256xf32>
    %cst_8 = arith.constant 0.000000e+00 : f32
    %24 = vector.broadcast %cst_8 : f32 to vector<1x256xf32>
    %25 = arith.select %22, %23, %24 : vector<1x256xi1>, vector<1x256xf32>
    %cst_9 = arith.constant dense<0.000000e+00> : vector<1xf32>
    %26 = vector.multi_reduction <add>, %25, %cst_9 [1] : vector<1x256xf32> to vector<1xf32>
    %27 = vector.shape_cast %26 : vector<1xf32> to vector<1x1xf32>
    %cst_10 = arith.constant 3.906250e-03 : f32
    %28 = vector.broadcast %cst_10 : f32 to vector<1x1xf32>
    %29 = arith.mulf %27, %28 : vector<1x1xf32>
    %30 = vector.shape_cast %29 : vector<1x1xf32> to vector<1x1xf32>
    %31 = vector.broadcast %30 : vector<1x1xf32> to vector<1x128xf32>
    %c0_11 = arith.constant 0 : index
    %c0_12 = arith.constant 0 : index
    %c0_13 = arith.constant 0 : index
    %32 = vector.load %arg5[%c0_11, %c0_12, %c0_13] : memref<1x1x128xf32, #tpu.memory_space<vmem>>, vector<1x1x128xf32>
    %33 = vector.shape_cast %32 : vector<1x1x128xf32> to vector<1x128xf32>
    %34 = vector.shape_cast %31 : vector<1x128xf32> to vector<1x1x128xf32>
    tpu.vector_store %arg5[%c0_11, %c0_12, %c0_13], %34 {strides = array<i32>} : memref<1x1x128xf32, #tpu.memory_space<vmem>>, vector<1x1x128xf32>,
    return
  }
  func.func @transform_0(%arg0: i32, %arg1: i32, %arg2: i32) -> (i32, i32, i32) {
    %c1_i32 = arith.constant 1 : i32
    %0 = arith.muli %arg1, %c1_i32 : i32
    %1 = arith.addi %0, %arg2 : i32
    %c0_i32 = arith.constant 0 : i32
    %c0_i32_0 = arith.constant 0 : i32
    return %arg0, %c0_i32, %1 : i32, i32, i32
  }
  func.func @transform_1(%arg0: i32, %arg1: i32, %arg2: i32) -> (i32, i32, i32) {
    %c1_i32 = arith.constant 1 : i32
    %0 = arith.muli %arg1, %c1_i32 : i32
    %1 = arith.addi %0, %arg2 : i32
    %c0_i32 = arith.constant 0 : i32
    %c0_i32_0 = arith.constant 0 : i32
    return %arg0, %c0_i32, %1 : i32, i32, i32
  }
  func.func @transform_2(%arg0: i32, %arg1: i32, %arg2: i32) -> (i32, i32, i32) {
    %c0_i32 = arith.constant 0 : i32
    %c0_i32_0 = arith.constant 0 : i32
    return %arg0, %arg1, %c0_i32 : i32, i32, i32
  }
}

</mosaic_0001>

<bundles_post_ra>
// kernel: tpu_custom_call.1
= control target key start
LH: loop header
LB: loop body
LE: loop exit
PB: predicated region body
PF: predicated region fallthrough
CT: control target
= control target key end

     0   :  { %7 = vsyncpa [#allocation3], 0  ;;  %s858_s0 = inlined_call_operand.hbm [shape: f32[2,4,256], index: 0, kind: input, shape index: {}]   ;;  %s859_s1 = inlined_call_operand.vmem [shape: s8[2,1,256], index: 1, kind: input, shape index: {}]   ;;  %s860_s2 = inlined_call_operand.hbm [shape: f32[2,1,128], index: 2, kind: output, shape index: {}]  }
   0x1   :  { %9 = vsyncpa [#allocation3 + $0x1], 0 }
   0x2   :  { %10 = vsyncpa [#allocation4], 0 }
   0x3   :  { %12 = vsyncpa [#allocation4 + $0x1], 0  ;;  %s668_s9 = smov 0   ;;  %s670_s10 = smov 0  }
   0x4   :  { %s672_s11 = smov 0   ;;  %s674_s12 = smov 0  }
   0x5   :  { %s676_s13 = smov 0   ;;  %s678_s14 = smov 0  }
   0x6 LB: > { %s454_s15 = sadd.s32 4294967295, %s649_s14   ;;  %s455_s16 = sadd.s32 4294967294, %s649_s14   ;;  %s649_s14 = sphi %s678_s14, %s18_s14   ;;  %s645_s13 = sphi %s676_s13, %s876_s13   ;;  %s641_s12 = sphi %s674_s12, %s875_s12   ;;  %s637_s11 = sphi %s672_s11, %s874_s11   ;;  %s633_s10 = sphi %s670_s10, %s873_s10   ;;  %s629_s9 = sphi %s668_s9, %s872_s9  }
   0x7   : > { %s37_s17 = sadd.s32 1, %s645_s13  ;;  %s48_s18 = sadd.s32 1, %s637_s11 }
   0x8   : > { %p39_p0 = scmp.ge.s32.totalorder %s37_s17, 2  ;;  %p55_p1 = scmp.ne.s32.totalorder %s637_s11, %s633_s10 }
   0x9   : > { %p56_p2 = scmp.eq.s32.totalorder %s649_s14, 0  ;;  %p61_p3 = scmp.ne.s32.totalorder %s633_s10, %s629_s9 }
   0xa   : > { %s878_s17 = smov (%p39_p0, %s37_s17), 0  ;;  %p62_p5 = scmp.eq.s32.totalorder %s454_s15, 0 }
   0xb   : > { %p709_p4 = por %p56_p2, %p55_p1  ;;  %s43_s20 = ssub.s32 %s645_s13, %s878_s17 }
   0xc   : > { %p117_p6 = scmp.eq.s32.totalorder %s454_s15, 1  ;;  %p46_p7 = scmp.eq.s32.totalorder %s43_s20, 0 }
   0xd   : > { %p715_p8 = por %p62_p5, %p61_p3  ;;  %p123_p10 = scmp.eq.s32.totalorder %s455_s16, 1 }
   0xe   : > { %p719_p9 = por %p117_p6, %p55_p1  ;;  %p480_p13 = scmp.lt.s32.totalorder %s649_s14, 2 }
   0xf   : > { %s724_s23 = scalar_select %p46_p7, %s637_s11, %s48_s18  }
  0x10   : > { %s864_s22 = scalar_select %p719_p9, 1, 0 }
  0x11   : > { %p726_p11 = por %p123_p10, %p61_p3  ;;  %s143_s25 = sand.u32 1, %s637_s11  }
  0x12   : > { %s458_s26 = sshll.u32 %s143_s25, 3  ;;  %s467_s27 = sshll.u32 %s645_s13, 7 }
  0x13   : > { %s865_s24 = scalar_select %p726_p11, 1, 0 }
  0x14   : > { %s737_s30 = scalar_lea.hbm %s858_s0, %s467_s27  ;;  %s147_s3 = scalar_lea.vmem [#allocation2], %s458_s26 }
  0x15   : > { %s158_s4 = sshll.u32 %s147_s3, 4  ;;  %p743_p0 = pnand %p480_p13, %p709_p4  ;;  %s739_s4 = int_to_ptr.vmem [resolvable:$true] %s158_s4 }
  0x16   : > { %s144_s6 = scalar_lea.sflag [#allocation3], %s143_s25  ;;  %s537_s7 = scalar_lea.hbm %s737_s30, 128 }
  0x17   : > { %p538_p3 = scmp.ne.s32.totalorder %s737_s30, %s537_s7  ;;  %p539_p5 = pneg %p743_p0 }
  0x18   : > { %s542_s16 = scalar_lea.hbm %s858_s0, 256  ;;  %p543_p4 = scmp.lt.u32.totalorder %s737_s30, %s858_s0 }
  0x19   : > { %p540_p6 = pnand %p539_p5, %p538_p3  ;;  %p544_p10 = scmp.lt.u32.totalorder %s542_s16, %s537_s7 }
  0x1a   : > { %p546_p12 = scmp.lt.u32.totalorder %s537_s7, %s737_s30 }
  0x1b   : > { %p541_p7 = pneg %p540_p6  ;;  %p545_p13 = por %p544_p10, %p543_p4 }
  0x1d   : > { %p547_p1 = por %p546_p12, %p545_p13 }
  0x1f   : > { %p548_p2 = pnand %p547_p1, %p541_p7 }
  0x21   : > { %551 = shalt.err (!%p548_p2)
}
  0x22   : > { %s552_s20 = scalar_lea.vmem %s739_s4, 128  ;;  %s651_s25 = smov [#allocation2]  }
  0x23   : > { %p553_p3 = scmp.ne.s32.totalorder %s739_s4, %s552_s20  ;;  %s557_s26 = sshll.u32 %s651_s25, 4  ;;  %s558_s26 = int_to_ptr.vmem [resolvable:$false] %s557_s26 }
  0x24   : > { %s559_s27 = scalar_lea.vmem %s558_s26, 256  ;;  %p560_p9 = scmp.lt.s32.totalorder %s739_s4, %s558_s26 }
  0x25   : > { %p555_p6 = pnand %p553_p3, %p539_p5  ;;  %p561_p4 = scmp.lt.s32.totalorder %s559_s27, %s552_s20 }
  0x27   : > { %p556_p11 = pneg %p555_p6  ;;  %p562_p10 = por %p561_p4, %p560_p9 }
  0x29   : > { %p563_p12 = pnand %p562_p10, %p556_p11 }
  0x2b   : > { %566 = shalt.err (!%p563_p12)
}
  0x2c   : > { %475 = dma.hbm_to_vmem [thread:$0]  (!%p743_p0), %s737_s30, 128, %s739_s4, %s144_s6  }
  0x2d   : > { %p867_p1 = scmp.lt.s32.totalorder %s649_s14, 3  ;;  %p868_p2 = scmp.ge.s32.totalorder %s649_s14, 1 }
  0x2f   : > { %p178_p5 = pnand %p868_p2, %p867_p1 }
  0x30   : > { %s779_s28 = sand.u32 (!%p178_p5), 1, %s633_s10  }
  0x31   : > { %181 = sbr.rel (%p178_p5) target bundleno = 288 (0x120), region = 28  ;;  %s462_s29 = sshll.u32 (!%p178_p5), %s779_s28, 3 }
  0x32   : > { %s184_s3 = scalar_lea.sflag (!%p178_p5), [#allocation3], %s779_s28  ;;  %s187_s7 = scalar_lea.vmem (!%p178_p5), [#allocation2], %s462_s29 }
  0x38   : > { %620 = dma.done.wait (%p715_p8), %s184_s3, 128  }
  0x39   : > { %622 = vsyncadd (%p715_p8), %s184_s3, 4294967168  ;;  %vm235_vm0 = vcmask 1043456   ;;  %p220_p9 = scmp.lt.s32.totalorder %s641_s12, 1  ;;  %v229_v0 = vld [vmem:[%s187_s7] sm:$0xff]  ;;  %v280_v11 = vlaneseq  ;;  %vm335_vm4 = vcmask 1040384   ;;  %s464_s8 = sshll.u32 %s641_s12, 4 }
  0x3a   : > { %v233_v1 = vcombine.high %v229_v0, %v229_v0  ;;  %v236_v2 = vsel %vm235_vm0, %v229_v0, -inf  ;;  %s215_s15 = scalar_lea.vmem [#allocation5], %s779_s28  ;;  %s809_s20 = scalar_lea.hbm %s860_s2, %s464_s8 }
  0x3b   : > { %v237_v3 = vrot.slane %v236_v2, 4  ;;  %s221_s30 = scalar_select %p220_p9, %s641_s12, 1  ;;  %v794_v16 = vshrl.u32 %v280_v11, 7 }
  0x3c   : > { %v243_v4 = vsel %vm235_vm0, %v233_v1, -inf  ;;  %s357_s16 = sshll.u32 %s215_s15, 4  ;;  %s344_s25 = scalar_lea.sflag [#allocation4], %s779_s28  ;;  %s811_s16 = int_to_ptr.vmem [resolvable:$true] %s357_s16 }
  0x3d   : > { %v238_v5 = vmax.f32 %v236_v2, %v237_v3  ;;  %v244_v6 = vrot.slane %v243_v4, 4  ;;  %s463_s4 = sshll.u32 %s221_s30, 1  ;;  %v284_v21 = vsub.s32 0, %v794_v16  ;;  %v288_v23 = vsub.s32 4, %v794_v16  ;;  %s567_s26 = scalar_lea.vmem %s811_s16, 16 }
  0x3e   : > { %s226_s6 = scalar_lea.vmem %s859_s1, %s463_s4  ;;  %p568_p8 = scmp.ne.s32.totalorder %s811_s16, %s567_s26 }
  0x3f   : > { %v239_v7 = vrot.slane %v238_v5, 2  ;;  %v245_v8 = vmax.f32 %v243_v4, %v244_v6  ;;  %v230_v17 = vld [vmem:[%s226_s6] sm:$0x3]  ;;  %p869_p11 = scmp.ne.s32.totalorder %s864_s22, 0  ;;  %s652_s12 = smov [#allocation5]  }
  0x40   : > { %v231_v19 = vunpack.c.0.s8 %v230_v17  ;;  %s571_s27 = sshll.u32 %s652_s12, 4  ;;  %s572_s27 = int_to_ptr.vmem [resolvable:$false] %s571_s27 }
  0x41   : > { %v240_v9 = vmax.f32 %v238_v5, %v239_v7  ;;  %v246_v10 = vrot.slane %v245_v8, 2  ;;  %p569_p0 = pnand %p568_p8, %p869_p11  ;;  %s573_s29 = scalar_lea.vmem %s572_s27, 32 }
  0x42   : > { %v285_v25 = vrot.slane %v231_v19, %v284_v21  ;;  %v289_v26 = vrot.slane %v231_v19, %v288_v23  ;;  %vm316_vm3 = vcmp.ne.s32.totalorder %v231_v19, 4294967295  ;;  %p574_p13 = scmp.lt.s32.totalorder %s811_s16, %s572_s27  ;;  %p575_p3 = scmp.lt.s32.totalorder %s573_s29, %s567_s26 }
  0x43   : > { %v241_v12 = vrot.slane %v240_v9, 1  ;;  %v247_v13 = vmax.f32 %v245_v8, %v246_v10  ;;  %p570_p7 = pneg %p569_p0 }
  0x44   : > { %v293_v27 = vrot.slane %v285_v25, %v284_v21  ;;  %v297_v28 = vrot.slane %v289_v26, %v284_v21  ;;  %p576_p6 = por %p575_p3, %p574_p13 }
  0x45   : > { %v242_v14 = vmax.f32 %v240_v9, %v241_v12  ;;  %v248_v15 = vrot.slane %v247_v13, 1 }
  0x46   : > { %vm298_vm1 = vcmp.eq.s32.totalorder %v794_v16, %v293_v27  ;;  %vm299_vm2 = vcmp.eq.s32.totalorder %v794_v16, %v297_v28  ;;  %p577_p4 = pnand %p576_p6, %p570_p7 }
  0x47   : > { %v249_v18 = vmax.f32 %v247_v13, %v248_v15  ;;  %v300_v29 = vsel %vm298_vm1, %v229_v0, 0.0  ;;  %v301_v33 = vsel %vm299_vm2, %v233_v1, 0.0 }
  0x48   : > { %v302_v35 = vsel %vm235_vm0, %v300_v29, 0.0  ;;  %v309_v39 = vsel %vm235_vm0, %v301_v33, 0.0 }
  0x49   : > { %v252_v20 = vcombine.low %v242_v14, %v249_v18  ;;  %v303_v40 = vrot.slane %v302_v35, 4  ;;  %v310_v43 = vrot.slane %v309_v39, 4 }
  0x4b   : > { %v254_v22 = vsub.f32 %v229_v0, %v252_v20  ;;  %v304_v46 = vadd.f32 %v303_v40, %v302_v35  ;;  %v311_v49 = vadd.f32 %v310_v43, %v309_v39 }
  0x4d   : > { %v255_v24 = vmul.f32 1.442695, %v254_v22  ;;  %v305_v52 = vrot.slane %v304_v46, 2  ;;  %v312_v54 = vrot.slane %v311_v49, 2 }
  0x4f   : > { %531 = vpow2.f32 %v255_v24  ;;  %v306_v55 = vadd.f32 %v305_v52, %v304_v46  ;;  %v313_v56 = vadd.f32 %v312_v54, %v311_v49 }
  0x51   : > { %v307_v57 = vrot.slane %v306_v55, 1  ;;  %v314_v58 = vrot.slane %v313_v56, 1 }
  0x53   : > { %v308_v61 = vadd.f32 %v307_v57, %v306_v55  ;;  %v315_v1 = vadd.f32 %v314_v58, %v313_v56 }
  0x59   : > { %v532_v30 = vpop.eup %531 }
  0x5a   : > { %v258_v31 = vcombine.high %v532_v30, %v532_v30  ;;  %v260_v32 = vsel %vm235_vm0, %v532_v30, 0.0 }
  0x5b   : > { %v261_v34 = vrot.slane %v260_v32, 4 }
  0x5c   : > { %v267_v36 = vsel %vm235_vm0, %v258_v31, 0.0 }
  0x5d   : > { %v262_v37 = vadd.f32 %v261_v34, %v260_v32  ;;  %v268_v38 = vrot.slane %v267_v36, 4 }
  0x5f   : > { %v263_v41 = vrot.slane %v262_v37, 2  ;;  %v269_v42 = vadd.f32 %v268_v38, %v267_v36 }
  0x61   : > { %v264_v44 = vadd.f32 %v263_v41, %v262_v37  ;;  %v270_v45 = vrot.slane %v269_v42, 2 }
  0x63   : > { %v265_v47 = vrot.slane %v264_v44, 1  ;;  %v271_v48 = vadd.f32 %v270_v45, %v269_v42 }
  0x65   : > { %v266_v50 = vadd.f32 %v265_v47, %v264_v44  ;;  %v272_v51 = vrot.slane %v271_v48, 1 }
  0x67   : > { %v273_v53 = vadd.f32 %v272_v51, %v271_v48  ;;  %533 = vlog2.f32 %v266_v50 }
  0x69   : > { %535 = vlog2.f32 %v273_v53 }
  0x71   : > { %v534_v59 = vpop.eup %533 }
  0x72   : > { %v275_v60 = vmul.f32 0.6931472, %v534_v59 }
  0x73   : > { %v536_v62 = vpop.eup %535 }
  0x74   : > { %v277_v63 = vmul.f32 0.6931472, %v536_v62  ;;  %v278_v0 = vadd.f32 %v275_v60, %v242_v14 }
  0x76   : > { %v279_v2 = vadd.f32 %v277_v63, %v249_v18  ;;  %v317_v3 = vsub.f32 %v278_v0, %v308_v61 }
  0x78   : > { %v318_v4 = vsub.f32 %v279_v2, %v315_v1 }
  0x7a   : > { %v321_v5 = vcombine.low %v317_v3, %v318_v4 }
  0x7c   : > { %v323_v6 = vsel %vm316_vm3, %v321_v5, 0.0 }
  0x7d   : > { %v328_v7 = vrot.slane %v323_v6, %v284_v21  ;;  %v332_v8 = vrot.slane %v323_v6, %v288_v23 }
  0x7f   : > { %v336_v9 = vsel %vm335_vm4, %v328_v7, 0.0  ;;  %v337_v10 = vsel %vm335_vm4, %v332_v8, 0.0 }
  0x80   : > { %v338_v11 = vadd.f32 %v337_v10, %v336_v9 }
  0x82   : > { %339 = vadd.xlane.f32.xlu0 %v338_v11 }
 0x10f   : > { %v340_v12 = vpop.xlane.xlu0 %339 }
 0x110   : > { %v341_v13 = vmul.f32 0.00390625, %v340_v12 }
 0x112   : > { %342 = vst [vmem:[%s215_s15] sm:$0x1] %v341_v13 }
 0x113   : > { %580 = shalt.err (!%p577_p4)
}
 0x114   : > { %s581_s28 = scalar_lea.hbm %s809_s20, 16  ;;  %s585_s30 = scalar_lea.hbm %s860_s2, 32 }
 0x115   : > { %p582_p10 = scmp.ne.s32.totalorder %s809_s20, %s581_s28  ;;  %p586_p2 = scmp.lt.u32.totalorder %s809_s20, %s860_s2 }
 0x116   : > { %p587_p5 = scmp.lt.u32.totalorder %s585_s30, %s581_s28  ;;  %p589_p8 = scmp.lt.u32.totalorder %s581_s28, %s809_s20 }
 0x117   : > { %p583_p12 = pnand %p582_p10, %p869_p11 }
 0x118   : > { %p588_p9 = por %p587_p5, %p586_p2 }
 0x119   : > { %p584_p1 = pneg %p583_p12 }
 0x11a   : > { %p590_p0 = por %p589_p8, %p588_p9 }
 0x11c   : > { %p591_p7 = pnand %p590_p0, %p584_p1 }
 0x11e   : > { %594 = shalt.err (!%p591_p7)
}
 0x11f   : > { %470 = dma.vmem_to_hbm [thread:$0]  (%p869_p11), %s811_s16, 16, %s809_s20, %s344_s25  }
 0x120 PF: > { %s369_s5 = sand.u32 1, %s629_s9   ;;  %p870_p13 = scmp.ne.s32.totalorder %s865_s24, 0 }
 0x121   : > { %p871_p3 = scmp.ge.s32.totalorder %s649_s14, 2  ;;  %s370_s6 = scalar_lea.sflag [#allocation4], %s369_s5 }
 0x123   : > { %p477_p6 = pnand %p871_p3, %p870_p13 }
 0x125   : > { %624 = dma.done.wait (!%p477_p6), %s370_s6, 16  }
 0x126   : > { %626 = vsyncadd (!%p477_p6), %s370_s6, 4294967280  ;;  %s18_s14 = sadd.s32 1, %s649_s14   ;;  %s872_s9 = smov %s633_s10 }
 0x127   : > { %p15_p4 = scmp.ge.s32.totalorder %s18_s14, 4   ;;  %s873_s10 = smov %s637_s11 }
 0x128   : > { %s874_s11 = smov %s724_s23  ;;  %s875_s12 = smov %s645_s13 }
 0x129   : > { %s876_s13 = smov %s878_s17  ;;  %17 = sbr.rel (!%p15_p4) target bundleno = 6 (0x6), region = 76 }
 0x130   :  { %374 = vsyncpa [#allocation3], 1 }
 0x131   :  { %376 = vsyncpa [#allocation3 + $0x1], 1 }
 0x132   :  { %377 = vsyncpa [#allocation4], 1 }
 0x133   :  { %379 = vsyncpa [#allocation4 + $0x1], 1 }

</bundles_post_ra>
